<compile_context>
chip_gen: v7x
topology: tpu7x:2x2x1
jax: 0.10.0
libtpu: 0.0.40
codegen_flags: <defaults>
</compile_context>

<pallas_src>
import jax
import jax.numpy as jnp
import numpy as np
from jax import lax
from jax.experimental import pallas as pl
from jax.experimental.pallas import tpu as pltpu

EPS = 1e-5

# ----------------------------- configuration --------------------------------
B = 4                 # logical batch
B_PAD = 8             # padded to a full f32 sublane tile
T = 8                 # feature sequence length
NOISE_DIM = 16
N_PAD = 128
UNITS = 32            # attribute_num_units (small test size)
U_PAD = 128

REAL_DIMS = (3, 2)                       # DISCRETE(3)->softmax, ZERO_ONE(2)->sigmoid
REAL_KINDS = ("softmax", "sigmoid")
ADDI_DIMS = (2, 2)                       # DISCRETE(2)->softmax, MINUSONE_ONE(2)->tanh
ADDI_KINDS = ("softmax", "tanh")
R_DIM = sum(REAL_DIMS)                   # 5
A_DIM = sum(ADDI_DIMS)                   # 4
D_ATTR = R_DIM + A_DIM                   # 9
HEAD_PAD = 128

F_NOISE = 16                             # per-step feature noise dim
F_PAD = 128
H_UNITS = 32                             # feature_num_units
H_PAD = 128
GPACK = 4 * H_UNITS                      # 4 LSTM gates packed into one 128-lane block
assert GPACK == 128

FEAT_DIMS = (3, 2)                       # feature_outputs: DISCRETE(3), ZERO_ONE(2)
FEAT_KINDS = ("softmax", "sigmoid")
FEATURE_DIM = sum(FEAT_DIMS)             # 5
SAMPLE_LEN = 2
FEAT_DIMS_FLAT = FEAT_DIMS * SAMPLE_LEN          # (3, 2, 3, 2)
FEAT_KINDS_FLAT = FEAT_KINDS * SAMPLE_LEN
D_FEAT = FEATURE_DIM * SAMPLE_LEN        # 10


def _segs(dims, kinds, base=0):
    segs, off = [], base
    for d, k in zip(dims, kinds):
        segs.append((off, d, k))
        off += d
    return tuple(segs)


REAL_SEGS = _segs(REAL_DIMS, REAL_KINDS, 0)        # lanes [0, 5)
ADDI_SEGS = _segs(ADDI_DIMS, ADDI_KINDS, R_DIM)    # lanes [5, 9)
FEAT_SEGS = _segs(FEAT_DIMS_FLAT, FEAT_KINDS_FLAT, 0)   # lanes [0, 10)

# stacked-parameter indices
IW_RW1, IW_RW2, IW_RHW, IW_AW1D, IW_AW1N, IW_AW2, IW_AHW = range(7)   # wattr (f32)
IF_WXA, IF_WXN, IF_WHH, IF_FHW = range(4)                              # wfeat (bf16)
(IV_RB1, IV_RG1, IV_RBE1, IV_RB2, IV_RG2, IV_RBE2, IV_RHB,
 IV_AB1, IV_AG1, IV_ABE1, IV_AB2, IV_AG2, IV_ABE2, IV_AHB,
 IV_BG, IV_FHB) = range(16)                                            # vecs (f32)


def _vmem():
    return pl.BlockSpec(memory_space=pltpu.MemorySpace.VMEM)


# ----------------------------- fused kernel ---------------------------------
def make_fused_kernel(shift_f, shift_g, shift_o):
    """shift_* are the static pltpu.roll amounts that bring gate blocks f/g/o
    (at lane offsets 32/64/96) onto lanes [0, 32)."""
    f32 = jnp.float32
    bf16 = jnp.bfloat16

    def fused_kernel(rn_ref, an_ref, fn_ref, h0_ref, c0_ref,
                     wattr_ref, wfeat_ref, vec_ref,
                     attr_ref, feat_ref, hseq_sc):
        vecs = vec_ref[...]                                  # (16, 128) f32

        def vrow(i):                                         # (1, 128)
            return vecs[i:i + 1, :]

        rmask = (lax.broadcasted_iota(jnp.int32, (B_PAD, U_PAD), 0) < B).astype(f32)

        def relu_bn(pre, g_idx, b_idx):
            # Linear -> ReLU -> BatchNorm1d (training mode, biased var); batch
            # statistics use only the B logical rows (padded rows masked out).
            h = jnp.maximum(pre, 0.0) * rmask
            mu = jnp.sum(h, axis=0, keepdims=True) * (1.0 / B)
            d = (h - mu) * rmask
            var = jnp.sum(d * d, axis=0, keepdims=True) * (1.0 / B)
            return (h - mu) * lax.rsqrt(var + EPS) * vrow(g_idx) + vrow(b_idx)

        def heads(h, w, b, segs, need_disc):
            # All heads of one group packed into one (., 128) weight -> one MXU
            # matmul.  Activations are applied full-width with lane masks so the
            # caller writes a single lane-dense 128-wide store.  All softmax
            # segments share one exp (per-lane segment max selected in first).
            logits = jnp.dot(h, w, preferred_element_type=f32) + b
            col = lax.broadcasted_iota(jnp.int32, logits.shape, 1)
            kinds = {k for _, _, k in segs}
            sig = jax.nn.sigmoid(logits) if "sigmoid" in kinds else None
            th = jnp.tanh(logits) if "tanh" in kinds else None
            attr = jnp.zeros_like(logits)
            disc = jnp.zeros_like(logits) if need_disc else None

            softmax_segs = [(o, d) for o, d, k in segs if k == "softmax"]
            if softmax_segs:
                segmax = logits              # off-segment lanes: exp(0)=1, masked later
                seg_info = []
                for o, d in softmax_segs:
                    in_seg = (col >= o) & (col < o + d)
                    m = jnp.max(jnp.where(in_seg, logits, -jnp.inf),
                                axis=-1, keepdims=True)
                    segmax = jnp.where(in_seg, m, segmax)
                    seg_info.append((in_seg, m))
                e = jnp.exp(logits - segmax)  # single full-width exp
                for in_seg, m in seg_info:
                    es = jnp.where(in_seg, e, 0.0)
                    s = jnp.sum(es, axis=-1, keepdims=True)
                    probs = es * pl.reciprocal(s, approx=True)
                    attr = jnp.where(in_seg, probs, attr)
                    if need_disc:
                        # one_hot(argmax), first-occurrence tie-break (torch.argmax)
                        first = jnp.min(jnp.where(in_seg & (logits == m), col, 1 << 20),
                                        axis=-1, keepdims=True)
                        disc = jnp.where(in_seg, (col == first).astype(f32), disc)
            for o, d, kind in segs:
                if kind == "softmax":
                    continue
                in_seg = (col >= o) & (col < o + d)
                v = sig if kind == "sigmoid" else th
                attr = jnp.where(in_seg, v, attr)
                if need_disc:
                    disc = jnp.where(in_seg, v, disc)
            return attr, disc

        # ---- real attribute generator: (Linear -> ReLU -> BN) x 2 ----------
        rn = rn_ref[...]
        h = relu_bn(jnp.dot(rn, wattr_ref[IW_RW1], preferred_element_type=f32)
                    + vrow(IV_RB1), IV_RG1, IV_RBE1)
        real_h = relu_bn(jnp.dot(h, wattr_ref[IW_RW2], preferred_element_type=f32)
                         + vrow(IV_RB2), IV_RG2, IV_RBE2)
        real_attr, real_disc = heads(real_h, wattr_ref[IW_RHW], vrow(IV_RHB),
                                     REAL_SEGS, True)

        # ---- additional attribute generator ---------------------------------
        # concat(real_disc, addi_noise) is folded into a split first-layer weight.
        an = an_ref[...]
        pre = (jnp.dot(real_disc, wattr_ref[IW_AW1D], preferred_element_type=f32)
               + jnp.dot(an, wattr_ref[IW_AW1N], preferred_element_type=f32)
               + vrow(IV_AB1))
        h = relu_bn(pre, IV_AG1, IV_ABE1)
        addi_h = relu_bn(jnp.dot(h, wattr_ref[IW_AW2], preferred_element_type=f32)
                         + vrow(IV_AB2), IV_AG2, IV_ABE2)
        addi_attr, addi_disc = heads(addi_h, wattr_ref[IW_AHW], vrow(IV_AHB),
                                     ADDI_SEGS, True)

        # real / addi groups live in disjoint lane ranges -> combine with one add.
        all_attr = real_attr + addi_attr
        all_disc = real_disc + addi_disc
        attr_ref[...] = all_attr                     # single lane-dense store

        # ---- LSTM ------------------------------------------------------------
        # Gates packed into ONE 128-lane block (i|f|g|o at lanes 0/32/64/96).
        # x_t = concat(all_disc, noise_t) folded into a split W_ih; the input
        # projection for the whole sequence plus the attribute contribution and
        # the fused bias are all computed BEFORE the serial recurrence.
        wxa = wfeat_ref[IF_WXA]          # (128, 128) bf16
        wxn = wfeat_ref[IF_WXN]          # (128, 128) bf16
        whh = wfeat_ref[IF_WHH]          # (128, 128) bf16 (rows >= 32 are zero)

        fx = fn_ref[...].reshape(T * B_PAD, F_PAD).astype(bf16)
        gx = jnp.dot(fx, wxn, preferred_element_type=f32).reshape(T, B_PAD, GPACK)
        gx_attr = (jnp.dot(all_disc.astype(bf16), wxa, preferred_element_type=f32)
                   + vrow(IV_BG))
        gx = gx + gx_attr[None]          # hoisted out of the recurrence

        h = h0_ref[...]                  # (8, 128) f32, lanes [0,32) meaningful
        c = c0_ref[...]
        for t in range(T):               # small static T; serial recurrence anyway
            gates = gx[t] + jnp.dot(h.astype(bf16), whh, preferred_element_type=f32)
            sg = jax.nn.sigmoid(gates)   # one sigmoid for i, f, o
            tg = jnp.tanh(gates)         # one tanh for g
            i_g = sg                                         # gate i at lanes [0,32)
            f_g = pltpu.roll(sg, shift_f, axis=1)            # gate f -> lanes [0,32)
            g_g = pltpu.roll(tg, shift_g, axis=1)            # gate g -> lanes [0,32)
            o_g = pltpu.roll(sg, shift_o, axis=1)            # gate o -> lanes [0,32)
            # lanes >= 32 of c/h carry finite garbage; whh/fhw rows >= 32 are
            # zero so it never contaminates the meaningful lanes.
            c = f_g * c + i_g * g_g
            h = o_g * jnp.tanh(c)
            hseq_sc[t] = h

        # ---- feature output heads: all time steps in one MXU pass -----------
        hs = hseq_sc[...].reshape(T * B_PAD, H_PAD).astype(bf16)
        feat_attr, _ = heads(hs, wfeat_ref[IF_FHW], vrow(IV_FHB), FEAT_SEGS, False)
        feat_ref[...] = feat_attr.reshape(T, B_PAD, HEAD_PAD)

    return fused_kernel


# ----------------------------- wrapper ---------------------------------------
def _pad(x, shape):
    y = jnp.zeros(shape, jnp.float32)
    return y.at[tuple(slice(0, s) for s in x.shape)].set(x)


def detect_roll_shifts():
    """Tiny probe: determine pltpu.roll's shift convention at runtime and return
    the static shifts that bring gate blocks at lane offsets 32/64/96 to lane 0."""
    def k(x_ref, o_ref):
        o_ref[...] = pltpu.roll(x_ref[...], 32, axis=1)

    x = jnp.zeros((8, 128), jnp.float32).at[:, 32].set(1.0)
    y = pl.pallas_call(
        k,
        out_shape=jax.ShapeDtypeStruct((8, 128), jnp.float32),
        in_specs=[_vmem()],
        out_specs=_vmem(),
    )(x)
    np_like = bool(np.asarray(y)[0, 64] == 1.0)   # jnp.roll semantics: lane 32 -> 64
    return (96, 64, 32) if np_like else (32, 64, 96)


def doppelganger_rnn_forward(packed, rn, an, fn, h0, c0, *, roll_shifts=(96, 64, 32)):
    wattr, wfeat, vecs = packed
    rn_p = _pad(rn, (B_PAD, N_PAD))
    an_p = _pad(an, (B_PAD, N_PAD))
    fn_p = _pad(jnp.transpose(fn, (1, 0, 2)), (T, B_PAD, F_PAD))
    h0_p = _pad(h0, (B_PAD, H_PAD))
    c0_p = _pad(c0, (B_PAD, H_PAD))

    attr_pad, feat_pad = pl.pallas_call(
        make_fused_kernel(*roll_shifts),
        out_shape=(jax.ShapeDtypeStruct((B_PAD, HEAD_PAD), jnp.float32),
                   jax.ShapeDtypeStruct((T, B_PAD, HEAD_PAD), jnp.float32)),
        in_specs=[_vmem()] * 8,
        out_specs=(_vmem(), _vmem()),
        scratch_shapes=[pltpu.VMEM((T, B_PAD, H_PAD), jnp.float32)],
    )(rn_p, an_p, fn_p, h0_p, c0_p, wattr, wfeat, vecs)

    all_attribute = attr_pad[:B, :D_ATTR]
    feats = jnp.transpose(feat_pad, (1, 0, 2))[:B, :, :D_FEAT]
    features = feats.reshape(B, T * SAMPLE_LEN, FEATURE_DIM)
    return all_attribute, features


# -------------------- synthetic parameters (shapes follow __init__) ----------
def init_logical_params(key):
    ks = jax.random.split(key, 6)
    sc = 0.1

    def lin(k, fi, fo):
        kw, kb = jax.random.split(k)
        return (jax.random.normal(kw, (fi, fo), jnp.float32) * sc,
                jax.random.normal(kb, (fo,), jnp.float32) * sc)

    def mlp(k, fi, u):
        k1, k2, k3, k4, k5, k6 = jax.random.split(k, 6)
        w1, b1 = lin(k1, fi, u)
        w2, b2 = lin(k2, u, u)
        g1 = 1.0 + 0.1 * jax.random.normal(k3, (u,), jnp.float32)
        g2 = 1.0 + 0.1 * jax.random.normal(k4, (u,), jnp.float32)
        be1 = 0.1 * jax.random.normal(k5, (u,), jnp.float32)
        be2 = 0.1 * jax.random.normal(k6, (u,), jnp.float32)
        return (w1, b1, g1, be1, w2, b2, g2, be2)

    def head_list(k, fi, dims):
        hk = jax.random.split(k, len(dims))
        return [lin(ki, fi, d) for ki, d in zip(hk, dims)]

    k_ih, k_hh, k_bi, k_bh = jax.random.split(ks[4], 4)
    lstm = (jax.random.normal(k_ih, (4 * H_UNITS, D_ATTR + F_NOISE), jnp.float32) * sc,
            jax.random.normal(k_hh, (4 * H_UNITS, H_UNITS), jnp.float32) * sc,
            jax.random.normal(k_bi, (4 * H_UNITS,), jnp.float32) * sc,
            jax.random.normal(k_bh, (4 * H_UNITS,), jnp.float32) * sc)

    return {
        "real_mlp": mlp(ks[0], NOISE_DIM, UNITS),
        "addi_mlp": mlp(ks[1], NOISE_DIM + R_DIM, UNITS),
        "real_heads": head_list(ks[2], UNITS, REAL_DIMS),
        "addi_heads": head_list(ks[3], UNITS, ADDI_DIMS),
        "lstm": lstm,
        "feat_heads": head_list(ks[5], H_UNITS, FEAT_DIMS_FLAT),
    }


def pack_padded_params(lp):
    """Consolidate everything into 3 stacked arrays: (7,128,128) f32 attribute
    weights, (4,128,128) bf16 feature weights (gate-packed), (16,128) f32 vecs."""
    def vpad(x):
        return jnp.zeros((HEAD_PAD,), jnp.float32).at[: x.shape[0]].set(x)

    def pack_heads(hds, segs):
        w = jnp.zeros((U_PAD, HEAD_PAD), jnp.float32)
        b = jnp.zeros((HEAD_PAD,), jnp.float32)
        for (hw, hb), (o, d, _) in zip(hds, segs):
            w = w.at[: hw.shape[0], o:o + d].set(hw)
            b = b.at[o:o + d].set(hb)
        return w, b

    # real attribute generator
    w1, b1, g1, be1, w2, b2, g2, be2 = lp["real_mlp"]
    rw1 = _pad(w1, (N_PAD, U_PAD))
    rw2 = _pad(w2, (U_PAD, U_PAD))
    rhw, rhb = pack_heads(lp["real_heads"], REAL_SEGS)

    # additional attribute generator: split first layer into disc / noise parts
    aw1, ab1, ag1, abe1, aw2l, ab2, ag2, abe2 = lp["addi_mlp"]
    aw1d = _pad(aw1[:R_DIM, :], (HEAD_PAD, U_PAD))
    aw1n = _pad(aw1[R_DIM:, :], (N_PAD, U_PAD))
    aw2 = _pad(aw2l, (U_PAD, U_PAD))
    ahw, ahb = pack_heads(lp["addi_heads"], ADDI_SEGS)

    wattr = jnp.stack([rw1, rw2, rhw, aw1d, aw1n, aw2, ahw])        # (7,128,128) f32

    # LSTM: W_ih split into (disc-attr, noise) parts, transposed; the 4 gates
    # (order i, f, g, o) are packed into ONE 128-lane block at lane offsets
    # 0/32/64/96; biases fused (b_ih + b_hh).  Stored in bf16.
    w_ih, w_hh, b_ih, b_hh = lp["lstm"]
    wxa = jnp.zeros((HEAD_PAD, GPACK), jnp.float32)
    wxn = jnp.zeros((F_PAD, GPACK), jnp.float32)
    whh = jnp.zeros((H_PAD, GPACK), jnp.float32)
    bg = jnp.zeros((GPACK,), jnp.float32)
    for k in range(4):
        blk = w_ih[k * H_UNITS:(k + 1) * H_UNITS, :]                 # (H, 25)
        c0_, c1_ = k * H_UNITS, (k + 1) * H_UNITS
        wxa = wxa.at[:D_ATTR, c0_:c1_].set(blk[:, :D_ATTR].T)
        wxn = wxn.at[:F_NOISE, c0_:c1_].set(blk[:, D_ATTR:].T)
        whh = whh.at[:H_UNITS, c0_:c1_].set(w_hh[c0_:c1_, :].T)
        bg = bg.at[c0_:c1_].set(b_ih[c0_:c1_] + b_hh[c0_:c1_])
    fhw, fhb = pack_heads(lp["feat_heads"], FEAT_SEGS)

    wfeat = jnp.stack([wxa, wxn, whh, fhw]).astype(jnp.bfloat16)     # (4,128,128) bf16

    vecs = jnp.stack([
        vpad(b1), vpad(g1), vpad(be1), vpad(b2), vpad(g2), vpad(be2), rhb,
        vpad(ab1), vpad(ag1), vpad(abe1), vpad(ab2), vpad(ag2), vpad(abe2), ahb,
        bg, fhb,
    ])                                                               # (16,128) f32

    return wattr, wfeat, vecs


# ------------------------- pure-JAX reference (unpadded) ---------------------
def ref_forward(lp, rn, an, fn, h0, c0):
    def bn(x, g, b):
        mu = jnp.mean(x, axis=0, keepdims=True)
        var = jnp.mean((x - mu) ** 2, axis=0, keepdims=True)
        return (x - mu) / jnp.sqrt(var + EPS) * g + b

    def mlp(x, p):
        w1, b1, g1, be1, w2, b2, g2, be2 = p
        h = bn(jnp.maximum(x @ w1 + b1, 0.0), g1, be1)
        return bn(jnp.maximum(h @ w2 + b2, 0.0), g2, be2)

    def heads(h, plist, kinds):
        attrs, discs = [], []
        for (w, b), kind in zip(plist, kinds):
            y = h @ w + b
            if kind == "softmax":
                attrs.append(jax.nn.softmax(y, axis=-1))
                discs.append(jax.nn.one_hot(jnp.argmax(y, axis=-1), y.shape[-1],
                                            dtype=jnp.float32))
            elif kind == "sigmoid":
                v = jax.nn.sigmoid(y); attrs.append(v); discs.append(v)
            else:
                v = jnp.tanh(y); attrs.append(v); discs.append(v)
        return jnp.concatenate(attrs, -1), jnp.concatenate(discs, -1)

    rh = mlp(rn, lp["real_mlp"])
    ra, rd = heads(rh, lp["real_heads"], REAL_KINDS)
    ah = mlp(jnp.concatenate([rd, an], axis=1), lp["addi_mlp"])
    aa, ad = heads(ah, lp["addi_heads"], ADDI_KINDS)
    all_attr = jnp.concatenate([ra, aa], axis=1)
    all_disc = jnp.concatenate([rd, ad], axis=1)

    fgi = jnp.concatenate(
        [jnp.broadcast_to(all_disc[:, None, :], (B, T, D_ATTR)), fn], axis=2)

    w_ih, w_hh, b_ih, b_hh = lp["lstm"]

    def cell(carry, x_t):
        h, c = carry
        gates = x_t @ w_ih.T + b_ih + h @ w_hh.T + b_hh
        i, f, g, o = jnp.split(gates, 4, axis=-1)
        c = jax.nn.sigmoid(f) * c + jax.nn.sigmoid(i) * jnp.tanh(g)
        h = jax.nn.sigmoid(o) * jnp.tanh(c)
        return (h, c), h

    (_, _), hs = lax.scan(cell, (h0, c0), jnp.transpose(fgi, (1, 0, 2)))
    hs = jnp.transpose(hs, (1, 0, 2))                      # (B, T, H)

    outs = []
    for (w, b), kind in zip(lp["feat_heads"], FEAT_KINDS_FLAT):
        y = hs @ w + b
        if kind == "softmax":
            outs.append(jax.nn.softmax(y, axis=-1))
        elif kind == "sigmoid":
            outs.append(jax.nn.sigmoid(y))
        else:
            outs.append(jnp.tanh(y))
    feats = jnp.concatenate(outs, axis=2).reshape(B, T * SAMPLE_LEN, FEATURE_DIM)
    return all_attr, feats


# ---------------------------------- main --------------------------------------
if __name__ == "__main__":
    key = jax.random.PRNGKey(0)
    kp, kr, ka, kf, kh, kc = jax.random.split(key, 6)

    lp = init_logical_params(kp)
    packed = pack_padded_params(lp)

    rn = jax.random.normal(kr, (B, NOISE_DIM), jnp.float32)
    an = jax.random.normal(ka, (B, NOISE_DIM), jnp.float32)
    fn = jax.random.normal(kf, (B, T, F_NOISE), jnp.float32)
    h0 = jax.random.normal(kh, (B, H_UNITS), jnp.float32)   # torch.randn h_0
    c0 = jax.random.normal(kc, (B, H_UNITS), jnp.float32)   # torch.randn c_0

    shifts = detect_roll_shifts()
    fwd = jax.jit(lambda a, b, c, d, e: doppelganger_rnn_forward(
        packed, a, b, c, d, e, roll_shifts=shifts))
    all_attribute, features = jax.block_until_ready(fwd(rn, an, fn, h0, c0))

    assert all_attribute.shape == (B, D_ATTR)
    assert features.shape == (B, T * SAMPLE_LEN, FEATURE_DIM)
    assert bool(jnp.all(jnp.isfinite(all_attribute)))
    assert bool(jnp.all(jnp.isfinite(features)))

    # numerical check against a pure-JAX reference of the full forward pass
    with jax.default_matmul_precision("highest"):
        ref_attr, ref_feats = ref_forward(lp, rn, an, fn, h0, c0)
    np.testing.assert_allclose(np.asarray(all_attribute), np.asarray(ref_attr),
                               rtol=1e-2, atol=1e-2)
    # feature path uses bf16 MXU operands (f32 accumulation) -> slightly looser
    np.testing.assert_allclose(np.asarray(features), np.asarray(ref_feats),
                               rtol=2e-2, atol=2e-2)

    # structural sanity: softmax head probabilities sum to 1
    np.testing.assert_allclose(np.asarray(all_attribute[:, :3].sum(-1)), 1.0, atol=5e-3)
    np.testing.assert_allclose(np.asarray(features[:, :, :3].sum(-1)), 1.0, atol=5e-3)

    print("KERNEL_OK")
</pallas_src>

<mosaic_0001>
module attributes {stable_mosaic.version = 11 : i64} {
  func.func @k(%arg0: memref<8x128xf32, #tpu.memory_space<vmem>>, %arg1: memref<8x128xf32, #tpu.memory_space<vmem>>) attributes {dimension_semantics = [], scalar_prefetch = 0 : i64, scratch_operands = 0 : i64, tpu.core_type = #tpu.core_type<tc>} {
    %c0 = arith.constant 0 : index
    %c0_0 = arith.constant 0 : index
    %0 = vector.load %arg0[%c0, %c0_0] : memref<8x128xf32, #tpu.memory_space<vmem>>, vector<8x128xf32>
    %c32_i32 = arith.constant 32 : i32
    %1 = tpu.dynamic_rotate %0 by %c32_i32 dim 1 : vector<8x128xf32>, i32 -> vector<8x128xf32>
    %c0_1 = arith.constant 0 : index
    %c0_2 = arith.constant 0 : index
    %2 = vector.load %arg1[%c0_1, %c0_2] : memref<8x128xf32, #tpu.memory_space<vmem>>, vector<8x128xf32>
    tpu.vector_store %arg1[%c0_1, %c0_2], %1 {strides = array<i32>} : memref<8x128xf32, #tpu.memory_space<vmem>>, vector<8x128xf32>,
    return
  }
}

</mosaic_0001>

<bundles_post_ra>
// kernel: tpu_custom_call.1
= control target key start
LH: loop header
LB: loop body
LE: loop exit
PB: predicated region body
PF: predicated region fallthrough
CT: control target
= control target key end

     0   :  { %6 = vsyncpa [#allocation3], 0  ;;  %s128_s0 = inlined_call_operand.hbm [shape: f32[8,128], index: 0, kind: input, shape index: {}]   ;;  %s129_s1 = inlined_call_operand.hbm [shape: f32[8,128], index: 1, kind: output, shape index: {}]  }
   0x1   :  { %7 = vsyncpa [#allocation4], 0  ;;  %s91_s6 = smov [#allocation2]   ;;  %s43_s10 = scalar_lea.hbm %s128_s0, 128 }
   0x2   :  { %s14_s7 = sshll.u32 %s91_s6, 4  ;;  %p44_p0 = scmp.ne.s32.totalorder %s128_s0, %s43_s10  ;;  %s15_s7 = int_to_ptr.vmem [resolvable:$true] %s14_s7 }
   0x3   :  { %p47_p1 = scmp.lt.u32.totalorder %s43_s10, %s128_s0 }
   0x5   :  { %p49_p2 = pnand %p47_p1, %p44_p0 }
   0x7   :  { %52 = shalt.err (!%p49_p2)
}
   0x8   :  { %s53_s15 = scalar_lea.vmem %s15_s7, 128  ;;  %p58_p4 = scmp.lt.s32.totalorder %s15_s7, %s15_s7 }
   0x9   :  { %p54_p3 = scmp.ne.s32.totalorder %s15_s7, %s53_s15  ;;  %p59_p5 = scmp.lt.s32.totalorder %s53_s15, %s53_s15 }
   0xb   :  { %p60_p6 = por %p59_p5, %p58_p4 }
   0xd   :  { %p61_p7 = pnand %p60_p6, %p54_p3 }
   0xf   :  { %64 = shalt.err (!%p61_p7)
}
  0x10   :  { %17 = dma.hbm_to_vmem [thread:$0]  %s128_s0, 128, %s15_s7, [#allocation3]  }
  0x11   :  { %87 = dma.done.wait [#allocation3], 128  }
  0x12   :  { %88 = vsyncadd [#allocation3], 4294967168  ;;  %v21_v0 = vld [vmem:[#allocation2] sm:$0xff]  ;;  %s92_s18 = smov 32   ;;  %s93_s19 = smov [#allocation5]  }
  0x13   :  { %22 = vrot.lane.b32.xlu0 %v21_v0, %s92_s18  ;;  %s31_s20 = sshll.u32 %s93_s19, 4  ;;  %s32_s20 = int_to_ptr.vmem [resolvable:$true] %s31_s20 }
  0x14   :  { %s65_s21 = scalar_lea.vmem %s32_s20, 128  ;;  %p70_p9 = scmp.lt.s32.totalorder %s32_s20, %s32_s20 }
  0x15   :  { %p66_p8 = scmp.ne.s32.totalorder %s32_s20, %s65_s21  ;;  %p71_p10 = scmp.lt.s32.totalorder %s65_s21, %s65_s21 }
  0x17   :  { %p72_p11 = por %p71_p10, %p70_p9 }
  0x19   :  { %p73_p12 = pnand %p72_p11, %p66_p8 }
  0x85   :  { %v23_v1 = vpop.permute.xlu0 %22 }
  0x86   :  { %24 = vst [vmem:[#allocation5] sm:$0xff] %v23_v1 }
  0x87   :  { %76 = shalt.err (!%p73_p12)
}
  0x88   :  { %s77_s0 = scalar_lea.hbm %s129_s1, 128 }
  0x89   :  { %p78_p13 = scmp.ne.s32.totalorder %s129_s1, %s77_s0  ;;  %p81_p0 = scmp.lt.u32.totalorder %s77_s0, %s129_s1 }
  0x8b   :  { %p83_p1 = pnand %p81_p0, %p78_p13 }
  0x8d   :  { %86 = shalt.err (!%p83_p1)
}
  0x8e   :  { %34 = dma.vmem_to_hbm [thread:$0]  %s32_s20, 128, %s129_s1, [#allocation4]  }
  0x8f   :  { %89 = dma.done.wait [#allocation4], 128  }
  0x90   :  { %90 = vsyncadd [#allocation4], 4294967168 }
  0x91   :  { %38 = vsyncpa [#allocation3], 1 }
  0x92   :  { %39 = vsyncpa [#allocation4], 1 }

</bundles_post_ra>
